<compile_context>
chip_gen: v6e
topology: v6e:2x2x1
jax: 0.10.0
libtpu: 0.0.40
codegen_flags: <defaults>
</compile_context>

<pallas_src>
import functools

import jax
import jax.numpy as jnp
import numpy as np
from jax.experimental import pallas as pl
from jax.experimental.pallas import tpu as pltpu


def _vmem_limit_bytes(frac=0.75, fallback=32 * 1024 * 1024):
    """Scoped-VMEM budget per generation (v5e/v6e: ~96 MiB, v7x: ~48 MiB)."""
    try:
        info = pltpu.get_tpu_info()
        cap = getattr(info, "vmem_capacity_bytes", None) or getattr(info, "vmem_bytes", None)
        if cap:
            return int(cap * frac)
    except Exception:
        pass
    return fallback


def _pick_row_tile(Ho, Wo, N, *, max_rows=256, min_steps=8):
    """Pick TILE_H (a divisor of Ho): target ~max_rows matmul rows (256-wide MXU on v6e/v7x)
    while keeping N * row_tiles >= min_steps grid steps (megacore + pipeline depth on v7x),
    and keeping the flattened row count sublane-aligned (multiple of 8) unless it is the full map.
    """
    divs = [d for d in range(1, Ho + 1) if Ho % d == 0]
    cands = [d for d in divs
             if d * Wo <= max(max_rows, Wo) and ((d * Wo) % 8 == 0 or d == Ho)]
    if not cands:
        cands = [1]
    for d in sorted(cands, reverse=True):
        if N * (Ho // d) >= min_steps:
            return d
    return max(cands)


def _conv_bn_act_kernel(lab_ref, x_ref, w_ref, scale_ref, bias_ref, o_ref, patch_ref,
                        *, KH, KW, TILE_H, Wo, Cin, use_act, use_lab):
    # lab_ref   : (2,) f32 in SMEM -> [lab_scale, lab_bias]
    # x_ref     : (Hp, Wp, Cin) bf16 padded image (batch dim squeezed; resident across row tiles)
    # w_ref     : (KH*KW*Cin, Cout_pad) bf16 conv weights in im2col layout
    # scale_ref : (1, Cout_pad) f32 folded BN scale  (gamma / sqrt(var + eps))
    # bias_ref  : (1, Cout_pad) f32 folded BN bias   (beta - mean * scale)
    # o_ref     : (M, Cout_pad) bf16 flat output row tile, M = TILE_H*Wo
    # patch_ref : (M, KH*KW*Cin) bf16 VMEM scratch holding the im2col slab
    r = pl.program_id(1)
    h0 = pl.multiple_of(r * TILE_H, TILE_H)
    M = TILE_H * Wo
    KWC = KW * Cin

    # Hoisted window load: (TILE_H + KH - 1, Wp, Cin) read once per row tile (no per-kh reloads).
    window = x_ref[pl.ds(h0, TILE_H + KH - 1), :, :]

    # im2col, bf16 end-to-end: ONE (M, KW*Cin)-wide stripe store per kh instead of KW narrow stores.
    for kh in range(KH):
        rows = window[kh:kh + TILE_H, :, :]                                # (TILE_H, Wp, Cin)
        stripe = jnp.concatenate(
            [rows[:, kw:kw + Wo, :].reshape(M, Cin) for kw in range(KW)],
            axis=-1)                                                       # (M, KW*Cin) bf16
        patch_ref[:, kh * KWC:(kh + 1) * KWC] = stripe

    # Single deep-K MXU matmul per row tile: bf16 x bf16 -> f32 accumulation.
    acc = jnp.dot(patch_ref[...], w_ref[...], preferred_element_type=jnp.float32)  # (M, Cout_pad)

    # Fused epilogue (f32): BatchNorm (inference) -> ReLU -> LearnableAffineBlock.
    out = acc * scale_ref[...] + bias_ref[...]
    if use_act:
        out = jnp.maximum(out, 0.0)
        if use_lab:
            # NOTE: padded channels [Cout:Cout_pad] pick up lab_bias here; the wrapper slices them
            # off. Zero them explicitly if the padded NHWC layout is ever kept downstream.
            out = lab_ref[0] * out + lab_ref[1]
    o_ref[...] = out.astype(o_ref.dtype)


def conv_bn_act(x_nchw, weight, bn_gamma, bn_beta, bn_mean, bn_var,
                lab_scale, lab_bias, *, stride=1, groups=1, padding='',
                use_act=True, use_lab=False, eps=1e-5):
    assert stride == 1 and groups == 1, "TODO(synk): stride>1 / grouped conv not implemented"
    Cout, Cin, KH, KW = weight.shape
    N, C, H, W = x_nchw.shape
    assert C == Cin

    LANES = 128
    Cout_pad = -(-Cout // LANES) * LANES

    # NCHW -> NHWC, bf16 (deliberate precision choice; XLA fuses the pad into this copy).
    x = jnp.transpose(x_nchw, (0, 2, 3, 1)).astype(jnp.bfloat16)
    if padding == 'same':
        # HGNet even-kernel "same" convention: nn.ZeroPad2d([0, 1, 0, 1]) + Conv2d(padding=0).
        # (Matches the PyTorch module exactly; it is only spatially-"same" for even kernels.)
        x_pad = jnp.pad(x, ((0, 0), (0, 1), (0, 1), (0, 0)))
    else:
        p = (KH - 1) // 2
        x_pad = jnp.pad(x, ((0, 0), (p, p), (p, p), (0, 0)))
    Hp, Wp = x_pad.shape[1], x_pad.shape[2]
    Ho, Wo = Hp - KH + 1, Wp - KW + 1

    # Weights: (Cout,Cin,KH,KW) -> (KH,KW,Cin,Cout) -> (KH*KW*Cin, Cout_pad), bf16.
    w2d = jnp.transpose(weight, (2, 3, 1, 0)).reshape(KH * KW * Cin, Cout)
    w2d = jnp.pad(w2d, ((0, 0), (0, Cout_pad - Cout))).astype(jnp.bfloat16)

    # Folded BN (inference) affine, zero-padded to the lane-dense channel width, f32.
    inv_std = 1.0 / jnp.sqrt(bn_var.astype(jnp.float32) + eps)
    bn_scale = bn_gamma.astype(jnp.float32) * inv_std
    bn_bias = bn_beta.astype(jnp.float32) - bn_mean.astype(jnp.float32) * bn_scale
    bn_scale = jnp.pad(bn_scale, (0, Cout_pad - Cout)).reshape(1, Cout_pad)
    bn_bias = jnp.pad(bn_bias, (0, Cout_pad - Cout)).reshape(1, Cout_pad)

    lab = jnp.array([lab_scale, lab_bias], dtype=jnp.float32)

    TILE_H = _pick_row_tile(Ho, Wo, N)
    RT = Ho // TILE_H
    M = TILE_H * Wo

    kernel = functools.partial(_conv_bn_act_kernel, KH=KH, KW=KW, TILE_H=TILE_H,
                               Wo=Wo, Cin=Cin, use_act=use_act, use_lab=use_lab)

    out_flat = pl.pallas_call(
        kernel,
        out_shape=jax.ShapeDtypeStruct((N, Ho * Wo, Cout_pad), jnp.bfloat16),
        grid=(N, RT),
        in_specs=[
            pl.BlockSpec(memory_space=pltpu.MemorySpace.SMEM),                 # LAB scalars
            pl.BlockSpec((None, Hp, Wp, Cin), lambda n, r: (n, 0, 0, 0)),      # padded image (resident over r)
            pl.BlockSpec((KH * KW * Cin, Cout_pad), lambda n, r: (0, 0)),      # im2col weights
            pl.BlockSpec((1, Cout_pad), lambda n, r: (0, 0)),                  # BN scale
            pl.BlockSpec((1, Cout_pad), lambda n, r: (0, 0)),                  # BN bias
        ],
        out_specs=pl.BlockSpec((None, M, Cout_pad), lambda n, r: (n, r, 0)),   # flat lane-dense rows
        scratch_shapes=[pltpu.VMEM((M, KH * KW * Cin), jnp.bfloat16)],
        compiler_params=pltpu.CompilerParams(
            dimension_semantics=("parallel", "parallel"),
            vmem_limit_bytes=_vmem_limit_bytes()),
    )(lab, x_pad, w2d, bn_scale, bn_bias)

    out_nhwc = out_flat.reshape(N, Ho, Wo, Cout_pad)[..., :Cout]
    # Slice + transpose + cast fuse into one XLA copy; only needed to honour the NCHW f32 interface.
    return jnp.transpose(out_nhwc, (0, 3, 1, 2)).astype(jnp.float32)


def _reference(x_nchw, weight, bn_gamma, bn_beta, bn_mean, bn_var,
               lab_scale, lab_bias, *, padding='', use_act=True, use_lab=False, eps=1e-5):
    KH = weight.shape[2]
    x = jnp.transpose(x_nchw, (0, 2, 3, 1)).astype(jnp.float32)
    if padding == 'same':
        x = jnp.pad(x, ((0, 0), (0, 1), (0, 1), (0, 0)))
    else:
        p = (KH - 1) // 2
        x = jnp.pad(x, ((0, 0), (p, p), (p, p), (0, 0)))
    w_hwio = jnp.transpose(weight, (2, 3, 1, 0)).astype(jnp.float32)
    y = jax.lax.conv_general_dilated(
        x, w_hwio, window_strides=(1, 1), padding='VALID',
        dimension_numbers=('NHWC', 'HWIO', 'NHWC'))
    inv_std = 1.0 / jnp.sqrt(bn_var.astype(jnp.float32) + eps)
    y = (y - bn_mean) * inv_std * bn_gamma + bn_beta
    if use_act:
        y = jnp.maximum(y, 0.0)
        if use_lab:
            y = lab_scale * y + lab_bias
    return jnp.transpose(y, (0, 3, 1, 2))


if __name__ == "__main__":
    key = jax.random.PRNGKey(0)
    k_x, k_w, k_g, k_b, k_m, k_v = jax.random.split(key, 6)

    N, Cin, H, W = 2, 4, 16, 16
    Cout, K = 8, 3

    x = jax.random.normal(k_x, (N, Cin, H, W), dtype=jnp.float32)
    weight = 0.1 * jax.random.normal(k_w, (Cout, Cin, K, K), dtype=jnp.float32)

    # BatchNorm2d parameters / running stats (deterministic synthetic values).
    bn_gamma = 1.0 + 0.1 * jax.random.normal(k_g, (Cout,), dtype=jnp.float32)
    bn_beta = 0.1 * jax.random.normal(k_b, (Cout,), dtype=jnp.float32)
    bn_mean = 0.05 * jax.random.normal(k_m, (Cout,), dtype=jnp.float32)
    bn_var = 1.0 + 0.1 * jax.random.uniform(k_v, (Cout,), dtype=jnp.float32)

    # LearnableAffineBlock parameters (non-default so the LAB path is exercised).
    lab_scale, lab_bias = 1.25, 0.05

    out = conv_bn_act(x, weight, bn_gamma, bn_beta, bn_mean, bn_var,
                      lab_scale, lab_bias,
                      stride=1, groups=1, padding='', use_act=True, use_lab=True)
    out = jax.block_until_ready(out)

    ref = _reference(x, weight, bn_gamma, bn_beta, bn_mean, bn_var,
                     lab_scale, lab_bias, padding='', use_act=True, use_lab=True)
    # bf16 activations/weights feed the MXU (f32 accumulation) and the output is stored as bf16,
    # so compare against the f32 reference with a tolerance covering that deliberate rounding.
    np.testing.assert_allclose(np.asarray(out), np.asarray(ref), rtol=5e-2, atol=5e-2)
    assert out.shape == (N, Cout, H, W)

    print("KERNEL_OK")
</pallas_src>

<mosaic_0001>
module attributes {stable_mosaic.version = 11 : i64} {
  func.func @_conv_bn_act_kernel(%arg0: i32, %arg1: i32, %arg2: memref<2xf32, #tpu.memory_space<smem>>, %arg3: memref<1x18x18x4xbf16, #tpu.memory_space<vmem>>, %arg4: memref<36x128xbf16, #tpu.memory_space<vmem>>, %arg5: memref<1x128xf32, #tpu.memory_space<vmem>>, %arg6: memref<1x128xf32, #tpu.memory_space<vmem>>, %arg7: memref<1x64x128xbf16, #tpu.memory_space<vmem>>, %arg8: memref<64x36xbf16, #tpu.memory_space<vmem>>) attributes {dimension_semantics = [#tpu.dimension_semantics<parallel>, #tpu.dimension_semantics<parallel>], iteration_bounds = array<i64: 2, 4>, scalar_prefetch = 0 : i64, scratch_operands = 1 : i64, tpu.core_type = #tpu.core_type<tc>, window_params = [{transform_indices = @transform_0, window_bounds = array<i64: 2>}, {transform_indices = @transform_1, window_bounds = array<i64: 1, 18, 18, 4>}, {pipeline_mode = #tpu.pipeline_mode<synchronous>, transform_indices = @transform_2, window_bounds = array<i64: 36, 128>}, {pipeline_mode = #tpu.pipeline_mode<synchronous>, transform_indices = @transform_3, window_bounds = array<i64: 1, 128>}, {pipeline_mode = #tpu.pipeline_mode<synchronous>, transform_indices = @transform_4, window_bounds = array<i64: 1, 128>}, {transform_indices = @transform_5, window_bounds = array<i64: 1, 64, 128>}]} {
    %c4_i32 = arith.constant 4 : i32
    %0 = arith.muli %arg1, %c4_i32 : i32
    %1 = tpu.assume_multiple %0, 4 : i32
    %c0 = arith.constant 0 : index
    %2 = arith.index_cast %1 : i32 to index
    %c0_0 = arith.constant 0 : index
    %c0_1 = arith.constant 0 : index
    %3 = vector.load %arg3[%c0, %2, %c0_0, %c0_1] : memref<1x18x18x4xbf16, #tpu.memory_space<vmem>>, vector<1x6x18x4xbf16>
    %4 = vector.shape_cast %3 : vector<1x6x18x4xbf16> to vector<6x18x4xbf16>
    %5 = vector.extract_strided_slice %4 {offsets = [0, 0, 0], sizes = [4, 18, 4], strides = [1, 1, 1]} : vector<6x18x4xbf16> to vector<4x18x4xbf16>
    %6 = vector.extract_strided_slice %5 {offsets = [0, 0, 0], sizes = [4, 16, 4], strides = [1, 1, 1]} : vector<4x18x4xbf16> to vector<4x16x4xbf16>
    %7 = vector.shape_cast %6 : vector<4x16x4xbf16> to vector<64x4xbf16>
    %8 = vector.extract_strided_slice %5 {offsets = [0, 1, 0], sizes = [4, 16, 4], strides = [1, 1, 1]} : vector<4x18x4xbf16> to vector<4x16x4xbf16>
    %9 = vector.shape_cast %8 : vector<4x16x4xbf16> to vector<64x4xbf16>
    %10 = vector.extract_strided_slice %5 {offsets = [0, 2, 0], sizes = [4, 16, 4], strides = [1, 1, 1]} : vector<4x18x4xbf16> to vector<4x16x4xbf16>
    %11 = vector.shape_cast %10 : vector<4x16x4xbf16> to vector<64x4xbf16>
    %12 = tpu.concatenate %7, %9, %11 in 1 : vector<64x4xbf16>, vector<64x4xbf16>, vector<64x4xbf16> -> vector<64x12xbf16>
    %c0_2 = arith.constant 0 : index
    %c0_3 = arith.constant 0 : index
    %13 = vector.load %arg8[%c0_2, %c0_3] : memref<64x36xbf16, #tpu.memory_space<vmem>>, vector<64x12xbf16>
    tpu.vector_store %arg8[%c0_2, %c0_3], %12 {strides = array<i32>} : memref<64x36xbf16, #tpu.memory_space<vmem>>, vector<64x12xbf16>,
    %14 = vector.extract_strided_slice %4 {offsets = [1, 0, 0], sizes = [4, 18, 4], strides = [1, 1, 1]} : vector<6x18x4xbf16> to vector<4x18x4xbf16>
    %15 = vector.extract_strided_slice %14 {offsets = [0, 0, 0], sizes = [4, 16, 4], strides = [1, 1, 1]} : vector<4x18x4xbf16> to vector<4x16x4xbf16>
    %16 = vector.shape_cast %15 : vector<4x16x4xbf16> to vector<64x4xbf16>
    %17 = vector.extract_strided_slice %14 {offsets = [0, 1, 0], sizes = [4, 16, 4], strides = [1, 1, 1]} : vector<4x18x4xbf16> to vector<4x16x4xbf16>
    %18 = vector.shape_cast %17 : vector<4x16x4xbf16> to vector<64x4xbf16>
    %19 = vector.extract_strided_slice %14 {offsets = [0, 2, 0], sizes = [4, 16, 4], strides = [1, 1, 1]} : vector<4x18x4xbf16> to vector<4x16x4xbf16>
    %20 = vector.shape_cast %19 : vector<4x16x4xbf16> to vector<64x4xbf16>
    %21 = tpu.concatenate %16, %18, %20 in 1 : vector<64x4xbf16>, vector<64x4xbf16>, vector<64x4xbf16> -> vector<64x12xbf16>
    %c0_4 = arith.constant 0 : index
    %c12 = arith.constant 12 : index
    %22 = vector.load %arg8[%c0_4, %c12] : memref<64x36xbf16, #tpu.memory_space<vmem>>, vector<64x12xbf16>
    tpu.vector_store %arg8[%c0_4, %c12], %21 {strides = array<i32>} : memref<64x36xbf16, #tpu.memory_space<vmem>>, vector<64x12xbf16>,
    %23 = vector.extract_strided_slice %4 {offsets = [2, 0, 0], sizes = [4, 18, 4], strides = [1, 1, 1]} : vector<6x18x4xbf16> to vector<4x18x4xbf16>
    %24 = vector.extract_strided_slice %23 {offsets = [0, 0, 0], sizes = [4, 16, 4], strides = [1, 1, 1]} : vector<4x18x4xbf16> to vector<4x16x4xbf16>
    %25 = vector.shape_cast %24 : vector<4x16x4xbf16> to vector<64x4xbf16>
    %26 = vector.extract_strided_slice %23 {offsets = [0, 1, 0], sizes = [4, 16, 4], strides = [1, 1, 1]} : vector<4x18x4xbf16> to vector<4x16x4xbf16>
    %27 = vector.shape_cast %26 : vector<4x16x4xbf16> to vector<64x4xbf16>
    %28 = vector.extract_strided_slice %23 {offsets = [0, 2, 0], sizes = [4, 16, 4], strides = [1, 1, 1]} : vector<4x18x4xbf16> to vector<4x16x4xbf16>
    %29 = vector.shape_cast %28 : vector<4x16x4xbf16> to vector<64x4xbf16>
    %30 = tpu.concatenate %25, %27, %29 in 1 : vector<64x4xbf16>, vector<64x4xbf16>, vector<64x4xbf16> -> vector<64x12xbf16>
    %c0_5 = arith.constant 0 : index
    %c24 = arith.constant 24 : index
    %31 = vector.load %arg8[%c0_5, %c24] : memref<64x36xbf16, #tpu.memory_space<vmem>>, vector<64x12xbf16>
    tpu.vector_store %arg8[%c0_5, %c24], %30 {strides = array<i32>} : memref<64x36xbf16, #tpu.memory_space<vmem>>, vector<64x12xbf16>,
    %c0_6 = arith.constant 0 : index
    %c0_7 = arith.constant 0 : index
    %32 = vector.load %arg8[%c0_6, %c0_7] : memref<64x36xbf16, #tpu.memory_space<vmem>>, vector<64x36xbf16>
    %c0_8 = arith.constant 0 : index
    %c0_9 = arith.constant 0 : index
    %33 = vector.load %arg4[%c0_8, %c0_9] : memref<36x128xbf16, #tpu.memory_space<vmem>>, vector<36x128xbf16>
    %cst = arith.constant dense<0.000000e+00> : vector<64x128xf32>
    %34 = tpu.matmul %32, %33, %cst {dimension_numbers = #tpu.dot_dimension_numbers<[1], [0], [0], [1], [0, 0, 1, 1], [], []>} : vector<64x36xbf16>, vector<36x128xbf16>, vector<64x128xf32> -> vector<64x128xf32>
    %c0_10 = arith.constant 0 : index
    %c0_11 = arith.constant 0 : index
    %35 = vector.load %arg5[%c0_10, %c0_11] : memref<1x128xf32, #tpu.memory_space<vmem>>, vector<1x128xf32>
    %36 = vector.broadcast %35 : vector<1x128xf32> to vector<64x128xf32>
    %37 = arith.mulf %34, %36 : vector<64x128xf32>
    %c0_12 = arith.constant 0 : index
    %c0_13 = arith.constant 0 : index
    %38 = vector.load %arg6[%c0_12, %c0_13] : memref<1x128xf32, #tpu.memory_space<vmem>>, vector<1x128xf32>
    %39 = vector.broadcast %38 : vector<1x128xf32> to vector<64x128xf32>
    %40 = arith.addf %37, %39 : vector<64x128xf32>
    %cst_14 = arith.constant 0.000000e+00 : f32
    %41 = vector.broadcast %cst_14 : f32 to vector<64x128xf32>
    %42 = arith.maximumf %40, %41 : vector<64x128xf32>
    %c0_15 = arith.constant 0 : index
    %43 = memref.load %arg2[%c0_15] : memref<2xf32, #tpu.memory_space<smem>>
    %44 = vector.broadcast %43 : f32 to vector<64x128xf32>
    %45 = arith.mulf %44, %42 : vector<64x128xf32>
    %c1 = arith.constant 1 : index
    %46 = memref.load %arg2[%c1] : memref<2xf32, #tpu.memory_space<smem>>
    %47 = vector.broadcast %46 : f32 to vector<64x128xf32>
    %48 = arith.addf %45, %47 : vector<64x128xf32>
    %49 = arith.truncf %48 : vector<64x128xf32> to vector<64x128xbf16>
    %c0_16 = arith.constant 0 : index
    %c0_17 = arith.constant 0 : index
    %c0_18 = arith.constant 0 : index
    %50 = vector.load %arg7[%c0_16, %c0_17, %c0_18] : memref<1x64x128xbf16, #tpu.memory_space<vmem>>, vector<1x64x128xbf16>
    %51 = vector.shape_cast %50 : vector<1x64x128xbf16> to vector<64x128xbf16>
    %52 = vector.shape_cast %49 : vector<64x128xbf16> to vector<1x64x128xbf16>
    tpu.vector_store %arg7[%c0_16, %c0_17, %c0_18], %52 {strides = array<i32>} : memref<1x64x128xbf16, #tpu.memory_space<vmem>>, vector<1x64x128xbf16>,
    return
  }
  func.func @transform_0(%arg0: i32, %arg1: i32) -> i32 {
    %c0_i32 = arith.constant 0 : i32
    %c0_i32_0 = arith.constant 0 : i32
    return %c0_i32 : i32
  }
  func.func @transform_1(%arg0: i32, %arg1: i32) -> (i32, i32, i32, i32) {
    %c0_i32 = arith.constant 0 : i32
    %c0_i32_0 = arith.constant 0 : i32
    %c0_i32_1 = arith.constant 0 : i32
    %c0_i32_2 = arith.constant 0 : i32
    return %arg0, %c0_i32, %c0_i32_0, %c0_i32_1 : i32, i32, i32, i32
  }
  func.func @transform_2(%arg0: i32, %arg1: i32) -> (i32, i32) {
    %c0_i32 = arith.constant 0 : i32
    %c0_i32_0 = arith.constant 0 : i32
    %c0_i32_1 = arith.constant 0 : i32
    return %c0_i32, %c0_i32_0 : i32, i32
  }
  func.func @transform_3(%arg0: i32, %arg1: i32) -> (i32, i32) {
    %c0_i32 = arith.constant 0 : i32
    %c0_i32_0 = arith.constant 0 : i32
    %c0_i32_1 = arith.constant 0 : i32
    return %c0_i32, %c0_i32_0 : i32, i32
  }
  func.func @transform_4(%arg0: i32, %arg1: i32) -> (i32, i32) {
    %c0_i32 = arith.constant 0 : i32
    %c0_i32_0 = arith.constant 0 : i32
    %c0_i32_1 = arith.constant 0 : i32
    return %c0_i32, %c0_i32_0 : i32, i32
  }
  func.func @transform_5(%arg0: i32, %arg1: i32) -> (i32, i32, i32) {
    %c0_i32 = arith.constant 0 : i32
    %c0_i32_0 = arith.constant 0 : i32
    return %arg0, %arg1, %c0_i32 : i32, i32, i32
  }
}

</mosaic_0001>

<bundles_post_ra>
// kernel: tpu_custom_call.1
= control target key start
LH: loop header
LB: loop body
LE: loop exit
PB: predicated region body
PF: predicated region fallthrough
CT: control target
= control target key end

     0   :  { %10 = vsyncpa [#allocation5], 0  ;;  %s1832_s0 = inlined_call_operand.vmem [shape: f32[2], index: 0, kind: input, shape index: {}]   ;;  %s1833_s1 = inlined_call_operand.vmem [shape: bf16[2,18,18,4], index: 1, kind: input, shape index: {}]   ;;  %s1834_s2 = inlined_call_operand.vmem [shape: bf16[36,128], index: 2, kind: input, shape index: {}]   ;;  %s1835_s3 = inlined_call_operand.vmem [shape: f32[1,128], index: 3, kind: input, shape index: {}]   ;;  %s1836_s4 = inlined_call_operand.vmem [shape: f32[1,128], index: 4, kind: input, shape index: {}]   ;;  %s1837_s5 = inlined_call_operand.hbm [shape: bf16[2,256,128], index: 5, kind: output, shape index: {}]  }
   0x1   :  { %11 = vsyncpa [#allocation4], 0 }
   0x2   :  { %13 = vsyncpa [#allocation4 + $0x1], 0  ;;  %s1430_s18 = smov 0   ;;  %s1432_s19 = smov 0  }
   0x3   :  { %s1434_s20 = smov 0   ;;  %s1436_s21 = smov 0  }
   0x4   :  { %s1438_s22 = smov 0   ;;  %s1440_s23 = smov 0  }
   0x5   :  { %s1442_s24 = smov 0   ;;  %s1444_s25 = smov 0  }
   0x6 LB: > { %s1042_s26 = sadd.s32 4294967295, %s1391_s25   ;;  %s1043_s27 = sadd.s32 4294967294, %s1391_s25   ;;  %s1391_s25 = sphi %s1444_s25, %s19_s25   ;;  %s1387_s24 = sphi %s1442_s24, %s1853_s24   ;;  %s1383_s23 = sphi %s1440_s23, %s1852_s23   ;;  %s1379_s22 = sphi %s1438_s22, %s1851_s22   ;;  %s1375_s21 = sphi %s1436_s21, %s1850_s21   ;;  %s1371_s20 = sphi %s1434_s20, %s1849_s20   ;;  %s1367_s19 = sphi %s1432_s19, %s1848_s19   ;;  %s1363_s18 = sphi %s1430_s18, %s1847_s18  }
   0x7   : > { %s28_s28 = sadd.s32 1, %s1383_s23  ;;  %s31_s29 = sadd.s32 1, %s1387_s24 }
   0x8   : > { %p29_p0 = scmp.ge.s32.totalorder %s28_s28, 4  ;;  %s150_s30 = sadd.s32 1, %s1371_s20 }
   0x9   : > { %p160_p1 = scmp.ne.s32.totalorder %s1371_s20, %s1367_s19  ;;  %p161_p2 = scmp.eq.s32.totalorder %s1042_s26, 7 }
   0xa   : > { %s1855_s28 = smov (%p29_p0, %s28_s28), 0  ;;  %s1857_s29 = smov (!%p29_p0, %s31_s29), %s1387_s24 }
   0xb   : > { %s146_s6 = ssub.s32 %s1383_s23, %s1855_s28  ;;  %p1482_p3 = por %p161_p2, %p160_p1 }
   0xc   : > { %p33_p4 = scmp.ge.s32.totalorder %s1857_s29, 2  ;;  %p166_p5 = scmp.ne.s32.totalorder %s1367_s19, %s1363_s18 }
   0xd   : > { %p167_p6 = scmp.eq.s32.totalorder %s1043_s27, 7  ;;  %p1044_p7 = scmp.ge.s32.totalorder %s1391_s25, 1 }
   0xe   : > { %s1859_s29 = smov (%p33_p4, %s1857_s29), 0  ;;  %p174_p9 = scmp.lt.s32.totalorder %s1391_s25, 9 }
   0xf   : > { %p1491_p8 = por %p167_p6, %p166_p5  ;;  %s145_s9 = ssub.s32 %s1387_s24, %s1859_s29 }
  0x10   : > { %s147_s10 = sor.u32 %s146_s6, %s145_s9  ;;  %p1498_p10 = pnand %p1044_p7, %p174_p9 }
  0x11   : > { %s1839_s8 = scalar_select %p1491_p8, 1, 0 }
  0x12   : > { %p148_p11 = scmp.eq.s32.totalorder %s147_s10, 0  ;;  %p1502_p12 = scmp.eq.s32.totalorder %s1042_s26, 0 }
  0x13   : > { %p1186_p13 = pneg %p1498_p10  ;;  %s187_s15 = sshll.u32 %s1832_s0, 4  ;;  %s188_s15 = int_to_ptr.vmem [resolvable:$true] %s187_s15 }
  0x14   : > { %s1512_s16 = scalar_select %p148_p11, %s1371_s20, %s150_s30  }
  0x15   : > { %p1187_p0 = pnand %p1502_p12, %p1186_p13  ;;  %s1280_s17 = scalar_lea.vmem %s188_s15, 16 }
  0x16   : > { %p1281_p1 = scmp.ne.s32.totalorder %s188_s15, %s1280_s17  ;;  %p1288_p6 = scmp.lt.s32.totalorder %s188_s15, %s188_s15 }
  0x17   : > { %p1282_p2 = pneg %p1187_p0  ;;  %p1289_p7 = scmp.lt.s32.totalorder %s1280_s17, %s1280_s17 }
  0x19   : > { %p1283_p4 = pnand %p1282_p2, %p1281_p1  ;;  %p1290_p9 = por %p1289_p7, %p1288_p6 }
  0x1b   : > { %p1284_p5 = pneg %p1283_p4 }
  0x1d   : > { %p1291_p8 = pnand %p1290_p9, %p1284_p5 }
  0x1f   : > { %1294 = shalt.err (!%p1291_p8)
}
  0x20   : > { %s1393_s26 = smov [#allocation3]   ;;  %217 = sbr.rel (%p1498_p10) target bundleno = 573 (0x23d), region = 40 }
  0x21   : > { %1189 = dma.vmem_to_smem (!%p1187_p0), %s188_s15, 16, %s1393_s26, [#allocation5]  }
  0x25   : > { %1354 = dma.done.wait (%p1502_p12), [#allocation5], 16  }
  0x26   : > { %1356 = vsyncadd (%p1502_p12), [#allocation5], 4294967280 }
  0x27   : > { %223 = sfence }
  0x28   : > { %p246_p11 = scmp.lt.s32.totalorder %s1379_s22, 1  ;;  %s1118_s30 = smul.u32 48, %s1375_s21  ;;  %vm386_vm0 = vcmask 1042432   ;;  %vm387_vm1 = vcmask 1046532   ;;  %vm275_vm3 = vsmask.f32 3328 }
  0x29   : > { %vm1530_vm2 = vmor %vm386_vm0, %vm387_vm1  ;;  %vm276_vm4 = vsmask.f32 7440  ;;  %s1394_s12 = smov 8   ;;  %s1395_s14 = smov 4   ;;  %vm469_vm6 = vcmask 31744   ;;  %vm482_vm7 = vcmask 64512  }
  0x2a   : > { %s247_s27 = scalar_select %p246_p11, %s1379_s22, 1  ;;  %vm1607_vm5 = vmor %vm275_vm3, %vm276_vm4  ;;  %vm519_vm8 = vcmask 93184   ;;  %vm769_vm9 = vcmask 1041408   ;;  %vm609_vm10 = vcmask 191584   ;;  %vm699_vm11 = vcmask 289984  }
  0x2b   : > { %s1396_s15 = smov 12   ;;  %s1397_s10 = smov 24   ;;  %vm756_vm12 = vcmask 293888  }
  0x2c   : > { %s1179_s6 = smul.u32 216, %s247_s27  ;;  %s1103_s26 = sld [smem:[#allocation3 + $0x1]] }
  0x2d   : > { %s243_s27 = sand.u32 1, %s1367_s19   ;;  %s1114_s9 = sshll.u32 %s1379_s22, 5 }
  0x2e   : > { %s250_s11 = scalar_lea.vmem %s1833_s1, %s1179_s6  ;;  %s1113_s6 = sshll.u32 %s1375_s21, 3 }
  0x2f   : > { %s1528_s13 = scalar_lea.vmem %s250_s11, %s1118_s30  ;;  %s1049_s30 = sshll.u32 %s243_s27, 5 }
  0x30   : > { %v1535_v1 = vld [vmem:[%s1528_s13 + $0x24] sm:$0xf]  ;;  %v1538_v2 = vld [vmem:[%s1528_s13 + $0x28] sm:$0xf]  ;;  %v1541_v3 = vld [vmem:[%s1528_s13 + $0x2c] sm:$0x1] }
  0x31   : > { %v370_v4 = vshll.u32 %v1541_v3, 16  ;;  %v1057_v5 = vrot.slane %v1535_v1, 9  ;;  %v412_v6 = vrot.slane %v1538_v2, 5  ;;  %v415_v7 = vrot.slane %v1541_v3, 5  ;;  %v1548_v8 = vld [vmem:[%s1528_s13 + $0xc] sm:$0xf] }
  0x32   : > { %v1551_v9 = vld [vmem:[%s1528_s13 + $0x10] sm:$0xf]  ;;  %v262_v10 = vld [vmem:[%s1528_s13 + $0x14] sm:$0x1]  ;;  %v1055_v11 = vrot.slane %v1548_v8, 9  ;;  %v303_v12 = vshrl.u32 %v1548_v8, 16 }
  0x33   : > { %v413_v13 = vsel %vm1530_vm2, %v1057_v5, %v412_v6  ;;  %v414_v14 = vrot.slane %v412_v6, 4  ;;  %v322_v15 = vshll.u32 %v262_v10, 16  ;;  %v398_v16 = vrot.slane %v1551_v9, 5  ;;  %v1560_v17 = vld [vmem:[%s1528_s13 + $0x18] sm:$0xf]  ;;  %s245_s11 = scalar_lea.vmem [#allocation6], %s1049_s30 }
  0x34   : > { %v401_v18 = vrot.slane %v262_v10, 5  ;;  %v1563_v19 = vld [vmem:[%s1528_s13 + $0x1c] sm:$0xf]  ;;  %v265_v20 = vld [vmem:[%s1528_s13 + $0x20] sm:$0x1]  ;;  %v1056_v21 = vrot.slane %v1560_v17, 9 }
  0x35   : > { %v416_v22 = vsel %vm1530_vm2, %v414_v14, %v415_v7  ;;  %v399_v23 = vsel %vm1530_vm2, %v1055_v11, %v398_v16  ;;  %v400_v24 = vrot.slane %v398_v16, 4  ;;  %v405_v25 = vrot.slane %v1563_v19, 5  ;;  %v1573_v26 = vld [vmem:[%s1528_s13 + $0x30] sm:$0xf]  ;;  %v1576_v27 = vld [vmem:[%s1528_s13 + $0x34] sm:$0xf] }
  0x36   : > { %v1069_v28 = vcombine.low %v413_v13, %v416_v22  ;;  %v408_v29 = vrot.slane %v265_v20, 5  ;;  %v1579_v30 = vld [vmem:[%s1528_s13 + $0x38] sm:$0x1]  ;;  %v1078_v31 = vrot.slane %v1573_v26, 9  ;;  %v557_v32 = vrot.slane %v1576_v27, 5  ;;  %s952_s22 = sshll.u32 %s245_s11, 4  ;;  %s1776_s22 = int_to_ptr.vmem [resolvable:$true] %s952_s22 }
  0x37   : > { %v402_v33 = vsel %vm1530_vm2, %v400_v24, %v401_v18  ;;  %v406_v34 = vsel %vm1530_vm2, %v1056_v21, %v405_v25  ;;  %v407_v35 = vrot.slane %v405_v25, 4  ;;  %v560_v36 = vrot.slane %v1579_v30, 5  ;;  %s1780_s17 = scalar_lea.sflag [#allocation4], %s243_s27  ;;  %s1398_s30 = smov [#allocation6]  }
  0x38   : > { %467 = vrot.lane.b32.xlu0 %v1069_v28, %s1394_s12  ;;  %v1067_v37 = vcombine.low %v399_v23, %v402_v33  ;;  %v558_v38 = vsel %vm1530_vm2, %v1078_v31, %v557_v32  ;;  %v559_v39 = vrot.slane %v557_v32, 4  ;;  %v327_v40 = vshrl.u32 %v1560_v17, 16 }
  0x39   : > { %v409_v41 = vsel %vm1530_vm2, %v407_v35, %v408_v29  ;;  %v330_v42 = vshll.u32 %v1560_v17, 16  ;;  %v336_v43 = vshll.u32 %v1563_v19, 16  ;;  %v340_v44 = vshrl.u32 %v1563_v19, 16 }
  0x3a   : > { %463 = vrot.lane.b32.xlu1 %v1067_v37, %s1394_s12  ;;  %v1068_v45 = vcombine.low %v406_v34, %v409_v41  ;;  %v561_v46 = vsel %vm1530_vm2, %v559_v39, %v560_v36  ;;  %v329_v47 = vrot.slane %v327_v40, 4  ;;  %v346_v48 = vshll.u32 %v265_v20, 16 }
  0x3b   : > { %v1081_v49 = vcombine.low %v558_v38, %v561_v46  ;;  %v332_v50 = vrot.slane %v330_v42, 5  ;;  %v338_v51 = vrot.slane %v336_v43, 5  ;;  %v342_v52 = vrot.slane %v340_v44, 4  ;;  %v1627_v38 = vld [vmem:[%s1528_s13 + $0x3c] sm:$0xf] }
  0x3c   : > { %465 = vrot.lane.b32.xlu0 %v1068_v45, %s1394_s12  ;;  %v348_v53 = vrot.slane %v346_v48, 5  ;;  %v305_v54 = vrot.slane %v303_v12, 4  ;;  %v306_v55 = vshll.u32 %v1548_v8, 16  ;;  %v312_v56 = vshll.u32 %v1551_v9, 16  ;;  %v1632_v42 = vld [vmem:[%s1528_s13 + $0x40] sm:$0xf] }
  0x3d   : > { %v333_v57 = vor.u32 %v332_v50, %v329_v47  ;;  %v343_v58 = vor.u32 %v342_v52, %v338_v51  ;;  %v316_v59 = vshrl.u32 %v1551_v9, 16  ;;  %v324_v60 = vrot.slane %v322_v15, 5  ;;  %v274_v50 = vld [vmem:[%s1528_s13 + $0x44] sm:$0x1] }
  0x3e   : > { %573 = vrot.lane.b32.xlu1 %v1081_v49, %s1394_s12  ;;  %v308_v62 = vrot.slane %v306_v55, 5  ;;  %v314_v63 = vrot.slane %v312_v56, 5  ;;  %v529_v5 = vshrl.u32 %v1573_v26, 16  ;;  %v532_v6 = vshll.u32 %v1573_v26, 16 }
  0x3f   : > { %v334_v7 = vrot.slane %v333_v57, 4  ;;  %v344_v10 = vrot.slane %v343_v58, 4  ;;  %v318_v11 = vrot.slane %v316_v59, 4  ;;  %v538_v12 = vshll.u32 %v1576_v27, 16 }
  0x40   : > { %v309_v13 = vor.u32 %v308_v62, %v305_v54  ;;  %v531_v14 = vrot.slane %v529_v5, 4  ;;  %v534_v15 = vrot.slane %v532_v6, 5  ;;  %v542_v16 = vshrl.u32 %v1576_v27, 16 }
  0x41   : > { %v339_v18 = vsel %vm1607_vm5, %v334_v7, %v338_v51  ;;  %v349_v20 = vsel %vm1607_vm5, %v344_v10, %v348_v53  ;;  %v319_v21 = vor.u32 %v318_v11, %v314_v63  ;;  %v540_v22 = vrot.slane %v538_v12, 5 }
  0x42   : > { %v1064_v23 = vcombine.low %v339_v18, %v349_v20  ;;  %v310_v24 = vrot.slane %v309_v13, 4  ;;  %v535_v25 = vor.u32 %v534_v15, %v531_v14  ;;  %v544_v28 = vrot.slane %v542_v16, 4  ;;  %v1653_v14 = vld [vmem:[%s1528_s13] sm:$0xf] }
  0x43   : > { %v320_v29 = vrot.slane %v319_v21, 4  ;;  %v548_v31 = vshll.u32 %v1579_v30, 16  ;;  %v351_v32 = vshrl.u32 %v1535_v1, 16  ;;  %v354_v33 = vshll.u32 %v1535_v1, 16 }
  0x44   : > { %445 = vrot.lane.b32.xlu1 %v1064_v23, %s1395_s14  ;;  %v315_v34 = vsel %vm1607_vm5, %v310_v24, %v314_v63  ;;  %v536_v35 = vrot.slane %v535_v25, 4  ;;  %v545_v36 = vor.u32 %v544_v28, %v540_v22  ;;  %v360_v37 = vshll.u32 %v1538_v2, 16  ;;  %v1660_v23 = vld [vmem:[%s1528_s13 + $0x4] sm:$0xf] }
  0x45   : > { %v325_v30 = vsel %vm1607_vm5, %v320_v29, %v324_v60  ;;  %v550_v39 = vrot.slane %v548_v31, 5  ;;  %v353_v40 = vrot.slane %v351_v32, 4  ;;  %v356_v41 = vrot.slane %v354_v33, 5  ;;  %v259_v29 = vld [vmem:[%s1528_s13 + $0x8] sm:$0x1] }
  0x46   : > { %v1063_v43 = vcombine.low %v315_v34, %v325_v30  ;;  %v541_v44 = vsel %vm1607_vm5, %v536_v35, %v540_v22  ;;  %v546_v45 = vrot.slane %v545_v36, 4  ;;  %v362_v46 = vrot.slane %v360_v37, 5 }
  0x47   : > { %v357_v47 = vor.u32 %v356_v41, %v353_v40  ;;  %v364_v48 = vshrl.u32 %v1538_v2, 16  ;;  %v372_v49 = vrot.slane %v370_v4, 5  ;;  %v619_v51 = vshrl.u32 %v1627_v38, 16 }
  0x48   : > { %443 = vrot.lane.b32.xlu0 %v1063_v43, %s1395_s14  ;;  %v551_v52 = vsel %vm1607_vm5, %v546_v45, %v550_v39  ;;  %v622_v53 = vshll.u32 %v1627_v38, 16  ;;  %v628_v54 = vshll.u32 %v1632_v42, 16  ;;  %v632_v55 = vshrl.u32 %v1632_v42, 16 }
  0x49   : > { %v1080_v56 = vcombine.low %v541_v44, %v551_v52  ;;  %v358_v57 = vrot.slane %v357_v47, 4  ;;  %v366_v58 = vrot.slane %v364_v48, 4  ;;  %v621_v3 = vrot.slane %v619_v51, 4 }
  0x4a   : > { %v624_v4 = vrot.slane %v622_v53, 5  ;;  %v630_v59 = vrot.slane %v628_v54, 5  ;;  %v634_v60 = vrot.slane %v632_v55, 4  ;;  %v638_v62 = vshll.u32 %v274_v50, 16 }
  0x4b   : > { %568 = vrot.lane.b32.xlu1 %v1080_v56, %s1395_s14  ;;  %v363_v63 = vsel %vm1607_vm5, %v358_v57, %v362_v46  ;;  %v367_v5 = vor.u32 %v366_v58, %v362_v46  ;;  %v1084_v6 = vrot.slane %v1627_v38, 9  ;;  %v647_v7 = vrot.slane %v1632_v42, 5 }
  0x4c   : > { %v625_v10 = vor.u32 %v624_v4, %v621_v3  ;;  %v635_v11 = vor.u32 %v634_v60, %v630_v59  ;;  %v640_v12 = vrot.slane %v638_v62, 5  ;;  %v650_v13 = vrot.slane %v274_v50, 5 }
  0x4d   : > { %v368_v15 = vrot.slane %v367_v5, 4  ;;  %v648_v16 = vsel %vm1530_vm2, %v1084_v6, %v647_v7  ;;  %v649_v18 = vrot.slane %v647_v7, 4  ;;  %v1060_v20 = vcombine.low %v1560_v17, %v1563_v19 }
  0x4e   : > { %v626_v21 = vrot.slane %v625_v10, 4  ;;  %v636_v22 = vrot.slane %v635_v11, 4  ;;  %v1059_v28 = vcombine.low %v1548_v8, %v1551_v9  ;;  %v279_v31 = vshrl.u32 %v1653_v14, 16 }
  0x4f   : > { %v373_v24 = vsel %vm1607_vm5, %v368_v15, %v372_v49  ;;  %v651_v25 = vsel %vm1530_vm2, %v649_v18, %v650_v13  ;;  %v282_v36 = vshll.u32 %v1653_v14, 16  ;;  %v288_v37 = vshll.u32 %v1660_v23, 16 }
  0x50   : > { %v1065_v32 = vcombine.low %v363_v63, %v373_v24  ;;  %v631_v17 = vsel %vm1607_vm5, %v626_v21, %v630_v59  ;;  %v641_v19 = vsel %vm1607_vm5, %v636_v22, %v640_v12  ;;  %v1087_v33 = vcombine.low %v648_v16, %v651_v25  ;;  %v1273_v22 = vld [vmem:[%s1834_s2 + $0x10] ss:$0 sps:$4 sm:$0x33]  }
  0x51   : > { %v1086_v34 = vcombine.low %v631_v17, %v641_v19  ;;  %v281_v35 = vrot.slane %v279_v31, 4  ;;  %v292_v8 = vshrl.u32 %v1660_v23, 16  ;;  %v298_v9 = vshll.u32 %v259_v29, 16  ;;  %1177 = vmatprep.subr.msk.bf16.mxu0 %vm769_vm9, %v1273_v22  ;;  %1178 = vmatprep.subr.msk.bf16.mxu1 %vm769_vm9, %v1273_v22 }
  0x52   : > { %447 = vrot.lane.b32.xlu0 %v1065_v32, %s1395_s14  ;;  %663 = vrot.lane.b32.xlu1 %v1087_v33, %s1394_s12  ;;  %v1054_v30 = vrot.slane %v1653_v14, 9  ;;  %v391_v39 = vrot.slane %v1660_v23, 5  ;;  %v284_v40 = vrot.slane %v282_v36, 5  ;;  %v290_v41 = vrot.slane %v288_v37, 5  ;;  %v1274_v32 = vld [vmem:[%s1834_s2 + $0x8] sm:$0xff]  }
  0x53   : > { %v394_v43 = vrot.slane %v259_v29, 5  ;;  %v1079_v44 = vcombine.low %v1573_v26, %v1576_v27  ;;  %v294_v45 = vrot.slane %v292_v8, 4  ;;  %v1061_v49 = vcombine.low %v1535_v1, %v1538_v2 }
  0x54   : > { %v392_v46 = vsel %vm1530_vm2, %v1054_v30, %v391_v39  ;;  %v393_v47 = vrot.slane %v391_v39, 4  ;;  %v285_v48 = vor.u32 %v284_v40, %v281_v35  ;;  %v300_v51 = vrot.slane %v298_v9, 5  ;;  %v1276_v35 = vld [vmem:[%s1834_s2] sm:$0xff]  }
  0x55   : > { %v295_v50 = vor.u32 %v294_v45, %v290_v41  ;;  %v1085_v27 = vcombine.low %v1627_v38, %v1632_v42  ;;  %v1058_v0 = vcombine.low %v1653_v14, %v1660_v23  ;;  %v771_v24 = vsel %vm769_vm9, %v1273_v22, 0 }
  0x56   : > { %658 = vrot.lane.b32.xlu0 %v1086_v34, %s1395_s14  ;;  %v395_v52 = vsel %vm1530_vm2, %v393_v47, %v394_v43  ;;  %v286_v53 = vrot.slane %v285_v48, 4  ;;  %1158 = vmatpush3.bf16.msra.mxu0 %v771_v24 }
  0x57   : > { %v1066_v54 = vcombine.low %v392_v46, %v395_v52  ;;  %v296_v55 = vrot.slane %v295_v50, 4  ;;  %1174 = vmatpush3.bf16.msra.mxu1 %v771_v24  ;;  %1159 = vmatprep.subr.bf16.mxu0 %v1274_v32 }
  0x58   : > { %v291_v26 = vsel %vm1607_vm5, %v286_v53, %v290_v41  ;;  %1172 = vmatprep.subr.bf16.mxu1 %v1274_v32 }
  0x59   : > { %461 = vrot.lane.b32.xlu1 %v1066_v54, %s1394_s12  ;;  %v301_v1 = vsel %vm1607_vm5, %v296_v55, %v300_v51  ;;  %s876_s12 = sld [smem:[#allocation3]] }
  0x5a   : > { %v1062_v2 = vcombine.low %v291_v26, %v301_v1  ;;  %1160 = vmatpush3.bf16.msra.mxu0 %v1274_v32 }
  0x5b   : > { %1175 = vmatpush3.bf16.msra.mxu1 %v1274_v32  ;;  %1161 = vmatprep.subr.bf16.mxu0 %v1276_v35 }
  0x5c   : > { %441 = vrot.lane.b32.xlu0 %v1062_v2, %s1395_s14  ;;  %1173 = vmatprep.subr.bf16.mxu1 %v1276_v35  ;;  %v1102_v2 = vld [vmem:[%s1836_s4] ss:$0 sm:$0xff] }
  0x5e   : > { %1162 = vmatpush3.bf16.msra.mxu0 %v1276_v35 }
  0x5f   : > { %1176 = vmatpush3.bf16.msra.mxu1 %v1276_v35 }
  0xaa   : > { %v468_v57 = vpop.permute.xlu0 %467 }
  0xac   : > { %v464_v56 = vpop.permute.xlu1 %463 }
  0xae   : > { %v466_v3 = vpop.permute.xlu0 %465 }
  0xb0   : > { %v574_v58 = vpop.permute.xlu1 %573 }
  0xb6   : > { %v446_v4 = vpop.permute.xlu1 %445 }
  0xb7   : > { %v478_v59 = vsel %vm469_vm6, %v1060_v20, %v446_v4 }
  0xb8   : > { %v488_v60 = vsel %vm482_vm7, %v478_v59, %v466_v3 }
  0xb9   : > { %v1075_v61 = vcombine.high %v488_v60, %v488_v60  ;;  %v1074_v62 = vcombine.low %v488_v60, %v488_v60 }
  0xba   : > { %v444_v63 = vpop.permute.xlu0 %443 }
  0xbb   : > { %v475_v5 = vsel %vm469_vm6, %v1059_v28, %v444_v63  ;;  %524 = vst.msk [vmem:[#allocation2 + $0x10] sm:$0xf] %vm519_vm8, %v1074_v62  ;;  %525 = vst.msk [vmem:[#allocation2 + $0x14] sm:$0xf] %vm519_vm8, %v1075_v61  ;;  %v877_v63 = vstv %s876_s12 }
  0xbc   : > { %v486_v6 = vsel %vm482_vm7, %v475_v5, %v464_v56 }
  0xbd   : > { %v1073_v7 = vcombine.high %v486_v6, %v486_v6  ;;  %v1072_v10 = vcombine.low %v486_v6, %v486_v6  ;;  %v569_v13 = vpop.permute.xlu1 %568 }
  0xbe   : > { %v577_v18 = vsel %vm469_vm6, %v1079_v44, %v569_v13 }
  0xbf   : > { %587 = vrot.lane.b32.xlu1 %v1073_v7, %s1396_s15  ;;  %585 = vrot.lane.b32.xlu0 %v1072_v10, %s1396_s15  ;;  %522 = vst.msk [vmem:[#allocation2 + $0x8] sm:$0xf] %vm519_vm8, %v1072_v10  ;;  %523 = vst.msk [vmem:[#allocation2 + $0xc] sm:$0xf] %vm519_vm8, %v1073_v7  ;;  %v579_v23 = vsel %vm482_vm7, %v577_v18, %v574_v58 }
  0xc0   : > { %v1083_v28 = vcombine.high %v579_v23, %v579_v23  ;;  %v1082_v29 = vcombine.low %v579_v23, %v579_v23 }
  0xc4   : > { %v448_v11 = vpop.permute.xlu0 %447  ;;  %v664_v20 = vpop.permute.xlu1 %663 }
  0xc5   : > { %v481_v12 = vsel %vm469_vm6, %v1061_v49, %v448_v11 }
  0xc6   : > { %v490_v14 = vsel %vm482_vm7, %v481_v12, %v468_v57 }
  0xc7   : > { %v1077_v15 = vcombine.high %v490_v14, %v490_v14  ;;  %v1076_v16 = vcombine.low %v490_v14, %v490_v14 }
  0xc8   : > { %v659_v21 = vpop.permute.xlu0 %658 }
  0xc9   : > { %595 = vrot.lane.b32.xlu1 %v1077_v15, %s1396_s15  ;;  %593 = vrot.lane.b32.xlu0 %v1076_v16, %s1396_s15  ;;  %526 = vst.msk [vmem:[#allocation2 + $0x18] sm:$0xf] %vm519_vm8, %v1076_v16  ;;  %527 = vst.msk [vmem:[#allocation2 + $0x1c] sm:$0xf] %vm519_vm8, %v1077_v15  ;;  %v667_v36 = vsel %vm469_vm6, %v1085_v27, %v659_v21  ;;  %v1101_v27 = vld [vmem:[%s1835_s3] ss:$0 sm:$0xff] }
  0xca   : > { %v669_v37 = vsel %vm482_vm7, %v667_v36, %v664_v20 }
  0xcb   : > { %v462_v25 = vpop.permute.xlu1 %461  ;;  %v1088_v8 = vcombine.low %v669_v37, %v669_v37  ;;  %v1089_v9 = vcombine.high %v669_v37, %v669_v37 }
  0xcd   : > { %591 = vrot.lane.b32.xlu1 %v1075_v61, %s1396_s15  ;;  %589 = vrot.lane.b32.xlu0 %v1074_v62, %s1396_s15 }
  0xce   : > { %v442_v31 = vpop.permute.xlu0 %441 }
  0xcf   : > { %v472_v17 = vsel %vm469_vm6, %v1058_v0, %v442_v31 }
  0xd0   : > { %v484_v19 = vsel %vm482_vm7, %v472_v17, %v462_v25 }
  0xd1   : > { %599 = vrot.lane.b32.xlu1 %v1083_v28, %s1396_s15  ;;  %597 = vrot.lane.b32.xlu0 %v1082_v29, %s1396_s15  ;;  %v1070_v33 = vcombine.low %v484_v19, %v484_v19  ;;  %v1071_v34 = vcombine.high %v484_v19, %v484_v19 }
  0xd3   : > { %521 = vst.msk [vmem:[#allocation2 + $0x4] sm:$0xf] %vm519_vm8, %v1071_v34  ;;  %520 = vst.msk [vmem:[#allocation2] sm:$0xf] %vm519_vm8, %v1070_v33 }
  0xd5   : > { %677 = vrot.lane.b32.xlu1 %v1075_v61, %s1397_s10  ;;  %675 = vrot.lane.b32.xlu0 %v1074_v62, %s1397_s10 }
  0xd9   : > { %685 = vrot.lane.b32.xlu1 %v1083_v28, %s1397_s10  ;;  %683 = vrot.lane.b32.xlu0 %v1082_v29, %s1397_s10 }
  0xdd   : > { %681 = vrot.lane.b32.xlu1 %v1077_v15, %s1397_s10  ;;  %679 = vrot.lane.b32.xlu0 %v1076_v16, %s1397_s10  ;;  %v887_v16 = vstv %s1103_s26  ;;  %s1295_s26 = scalar_lea.vmem %s1776_s22, 512 }
  0xde   : > { %p1296_p8 = scmp.ne.s32.totalorder %s1776_s22, %s1295_s26 }
  0xe0   : > { %p1297_p10 = pnand %p1296_p8, %p1482_p3 }
  0xe1   : > { %689 = vrot.lane.b32.xlu1 %v1089_v9, %s1397_s10  ;;  %687 = vrot.lane.b32.xlu0 %v1088_v8, %s1397_s10  ;;  %s949_s10 = sadd.s32 %s1114_s9, %s1113_s6  ;;  %s1299_s6 = sshll.u32 %s1398_s30, 4  ;;  %s1300_s6 = int_to_ptr.vmem [resolvable:$false] %s1299_s6 }
  0xe2   : > { %s1115_s21 = sshll.u32 %s949_s10, 6  ;;  %p1298_p12 = pneg %p1297_p10 }
  0xe3   : > { %s1774_s15 = scalar_lea.hbm %s1837_s5, %s1115_s21  ;;  %s1301_s9 = scalar_lea.vmem %s1300_s6, 1024 }
  0xe4   : > { %p1302_p13 = scmp.lt.s32.totalorder %s1776_s22, %s1300_s6  ;;  %p1303_p0 = scmp.lt.s32.totalorder %s1301_s9, %s1295_s26 }
  0xe6   : > { %p1304_p1 = por %p1303_p0, %p1302_p13 }
  0xe8   : > { %p1305_p2 = pnand %p1304_p1, %p1298_p12 }
 0x131   : > { %v588_v30 = vpop.permute.xlu1 %587  ;;  %v586_v39 = vpop.permute.xlu0 %585 }
 0x132   : > { %611 = vst.msk [vmem:[#allocation2 + $0x4] sm:$0xf] %vm609_vm10, %v588_v30  ;;  %610 = vst.msk [vmem:[#allocation2] sm:$0xf] %vm609_vm10, %v586_v39 }
 0x13b   : > { %v596_v38 = vpop.permute.xlu1 %595  ;;  %v594_v42 = vpop.permute.xlu0 %593 }
 0x13c   : > { %615 = vst.msk [vmem:[#allocation2 + $0x14] sm:$0xf] %vm609_vm10, %v596_v38  ;;  %614 = vst.msk [vmem:[#allocation2 + $0x10] sm:$0xf] %vm609_vm10, %v594_v42 }
 0x13f   : > { %v592_v40 = vpop.permute.xlu1 %591  ;;  %v590_v41 = vpop.permute.xlu0 %589 }
 0x140   : > { %613 = vst.msk [vmem:[#allocation2 + $0xc] sm:$0xf] %vm609_vm10, %v592_v40  ;;  %612 = vst.msk [vmem:[#allocation2 + $0x8] sm:$0xf] %vm609_vm10, %v590_v41 }
 0x143   : > { %v600_v43 = vpop.permute.xlu1 %599  ;;  %v598_v44 = vpop.permute.xlu0 %597 }
 0x144   : > { %617 = vst.msk [vmem:[#allocation2 + $0x1c] sm:$0xf] %vm609_vm10, %v600_v43  ;;  %616 = vst.msk [vmem:[#allocation2 + $0x18] sm:$0xf] %vm609_vm10, %v598_v44 }
 0x147   : > { %v678_v45 = vpop.permute.xlu1 %677  ;;  %v676_v46 = vpop.permute.xlu0 %675 }
 0x148   : > { %701 = vst.msk [vmem:[#allocation2 + $0x4] sm:$0xf] %vm699_vm11, %v678_v45  ;;  %700 = vst.msk [vmem:[#allocation2] sm:$0xf] %vm699_vm11, %v676_v46 }
 0x14b   : > { %v686_v47 = vpop.permute.xlu1 %685  ;;  %v684_v48 = vpop.permute.xlu0 %683 }
 0x14c   : > { %705 = vst.msk [vmem:[#allocation2 + $0x14] sm:$0xf] %vm699_vm11, %v686_v47  ;;  %704 = vst.msk [vmem:[#allocation2 + $0x10] sm:$0xf] %vm699_vm11, %v684_v48 }
 0x14f   : > { %v682_v49 = vpop.permute.xlu1 %681  ;;  %v680_v50 = vpop.permute.xlu0 %679  ;;  %v1275_v51 = vld [vmem:[#allocation2] sm:$0xff]  }
 0x150   : > { %703 = vst.msk [vmem:[#allocation2 + $0xc] sm:$0xf] %vm699_vm11, %v682_v49  ;;  %702 = vst.msk [vmem:[#allocation2 + $0x8] sm:$0xf] %vm699_vm11, %v680_v50  ;;  %1163 = vmatprep.mubr.msk.bf16.mxu0 %vm756_vm12, %v1275_v51 }
 0x153   : > { %v690_v52 = vpop.permute.xlu1 %689  ;;  %v688_v53 = vpop.permute.xlu0 %687  ;;  %v1277_v54 = vld [vmem:[#allocation2 + $0x10] sm:$0xff]  }
 0x154   : > { %707 = vst.msk [vmem:[#allocation2 + $0x1c] sm:$0xf] %vm699_vm11, %v690_v52  ;;  %706 = vst.msk [vmem:[#allocation2 + $0x18] sm:$0xf] %vm699_vm11, %v688_v53  ;;  %1167 = vmatprep.mubr.msk.bf16.mxu1 %vm756_vm12, %v1277_v54 }
 0x157   : > { %v1278_v55 = vld [vmem:[#allocation2 + $0x8] sm:$0xff]  }
 0x158   : > { %1164 = vmatmul.mubr.msk.bf16.vlgmr.msra.gmra.mxu0 %vm756_vm12, %v1278_v55 }
 0x15b   : > { %v1279_v26 = vld [vmem:[#allocation2 + $0x18] sm:$0xff]  }
 0x15c   : > { %1168 = vmatmul.mubr.msk.bf16.vlgmr.msra.gmra.mxu1 %vm756_vm12, %v1279_v26 }
 0x218   : > { %v1165_v1 = vpop.f32.mrf.mxu0 }
 0x219   : > { %v847_v0 = vmul.f32 %v1165_v1, %v1101_v27 }
 0x21a   : > { %v807_v56 = vpop.f32.mrf.mxu0 }
 0x21b   : > { %v862_v57 = vadd.f32 %v1102_v2, %v847_v0  ;;  %v845_v58 = vmul.f32 %v1101_v27, %v807_v56 }
 0x21c   : > { %v1166_v3 = vpop.f32.mrf.mxu0  ;;  %v1169_v4 = vpop.f32.mrf.mxu1 }
 0x21d   : > { %v870_v59 = vmax.f32 %v862_v57, 0.0  ;;  %v860_v60 = vadd.f32 %v1102_v2, %v845_v58  ;;  %v848_v61 = vmul.f32 %v1166_v3, %v1101_v27  ;;  %v851_v62 = vmul.f32 %v1169_v4, %v1101_v27 }
 0x21e   : > { %v810_v5 = vpop.f32.mrf.mxu0  ;;  %v823_v6 = vpop.f32.mrf.mxu1 }
 0x21f   : > { %v863_v7 = vadd.f32 %v1102_v2, %v848_v61  ;;  %v866_v10 = vadd.f32 %v1102_v2, %v851_v62  ;;  %v868_v11 = vmax.f32 %v860_v60, 0.0  ;;  %v846_v12 = vmul.f32 %v1101_v27, %v810_v5 }
 0x220   : > { %v849_v13 = vmul.f32 %v1101_v27, %v823_v6  ;;  %v1170_v14 = vpop.f32.mrf.mxu1  ;;  %v880_v15 = vmul.f32 %v877_v63, %v870_v59 }
 0x221   : > { %v871_v18 = vmax.f32 %v863_v7, 0.0  ;;  %v874_v20 = vmax.f32 %v866_v10, 0.0  ;;  %v861_v21 = vadd.f32 %v1102_v2, %v846_v12  ;;  %v852_v23 = vmul.f32 %v1170_v14, %v1101_v27 }
 0x222   : > { %v864_v22 = vadd.f32 %v1102_v2, %v849_v13  ;;  %v826_v24 = vpop.f32.mrf.mxu1  ;;  %v878_v29 = vmul.f32 %v877_v63, %v868_v11  ;;  %v890_v19 = vadd.f32 %v887_v16, %v880_v15 }
 0x223   : > { %v881_v25 = vmul.f32 %v877_v63, %v871_v18  ;;  %v850_v28 = vmul.f32 %v1101_v27, %v826_v24  ;;  %v869_v31 = vmax.f32 %v861_v21, 0.0  ;;  %v867_v17 = vadd.f32 %v1102_v2, %v852_v23 }
 0x224   : > { %v872_v32 = vmax.f32 %v864_v22, 0.0  ;;  %v884_v35 = vmul.f32 %v877_v63, %v874_v20  ;;  %v888_v39 = vadd.f32 %v887_v16, %v878_v29 }
 0x225   : > { %v891_v33 = vadd.f32 %v887_v16, %v881_v25  ;;  %v865_v34 = vadd.f32 %v1102_v2, %v850_v28  ;;  %v879_v36 = vmul.f32 %v877_v63, %v869_v31  ;;  %v875_v37 = vmax.f32 %v867_v17, 0.0 }
 0x226   : > { %v882_v9 = vmul.f32 %v877_v63, %v872_v32  ;;  %v894_v41 = vadd.f32 %v887_v16, %v884_v35 }
 0x227   : > { %v1135_v8 = vpack.c.bf16 %v891_v33, %v890_v19  ;;  %v873_v30 = vmax.f32 %v865_v34, 0.0  ;;  %v889_v38 = vadd.f32 %v887_v16, %v879_v36  ;;  %v885_v42 = vmul.f32 %v877_v63, %v875_v37 }
 0x228   : > { %v892_v45 = vadd.f32 %v887_v16, %v882_v9 }
 0x229   : > { %1147 = vst [vmem:[%s245_s11 + $0x8] sm:$0xff] %v1135_v8   ;;  %v883_v40 = vmul.f32 %v877_v63, %v873_v30  ;;  %v1130_v43 = vpack.c.bf16 %v889_v38, %v888_v39  ;;  %v895_v44 = vadd.f32 %v887_v16, %v885_v42 }
 0x22b   : > { %v893_v46 = vadd.f32 %v887_v16, %v883_v40  ;;  %1131 = vst [vmem:[%s245_s11] sm:$0xff] %v1130_v43   ;;  %v1145_v47 = vpack.c.bf16 %v895_v44, %v894_v41 }
 0x22d   : > { %v1140_v48 = vpack.c.bf16 %v893_v46, %v892_v45  ;;  %1149 = vst [vmem:[%s245_s11 + $0x18] sm:$0xff] %v1145_v47  }
 0x22f   : > { %1148 = vst [vmem:[%s245_s11 + $0x10] sm:$0xff] %v1140_v48  }
 0x230   : > { %1308 = shalt.err (!%p1305_p2)
}
 0x231   : > { %s1309_s27 = scalar_lea.hbm %s1774_s15, 512  ;;  %s1313_s21 = scalar_lea.hbm %s1837_s5, 4096 }
 0x232   : > { %p1310_p4 = scmp.ne.s32.totalorder %s1774_s15, %s1309_s27  ;;  %p1314_p7 = scmp.lt.s32.totalorder %s1774_s15, %s1837_s5 }
 0x233   : > { %p1315_p9 = scmp.lt.s32.totalorder %s1313_s21, %s1309_s27 }
 0x234   : > { %p1311_p5 = pnand %p1310_p4, %p1482_p3 }
 0x235   : > { %p1316_p11 = por %p1315_p9, %p1314_p7 }
 0x236   : > { %p1312_p6 = pneg %p1311_p5 }
 0x238   : > { %p1317_p8 = pnand %p1316_p11, %p1312_p6 }
 0x23a   : > { %1320 = shalt.err (!%p1317_p8)
}
 0x23b   : > { %s1399_s26 = smov 64  }
 0x23c   : > { %1184 = dma.vmem_to_hbm [thread:$0]  (%p1482_p3), %s1776_s22, 512, %s1774_s15, %s1780_s17, %s1399_s26, %s1399_s26, %s1395_s14  }
 0x23d PF: > { %p1196_p10 = scmp.ge.s32.totalorder %s1391_s25, 2  ;;  %s967_s30 = sand.u32 1, %s1363_s18  }
 0x23e   : > { %p1846_p12 = scmp.ne.s32.totalorder %s1839_s8, 0  ;;  %s968_s6 = scalar_lea.sflag [#allocation4], %s967_s30 }
 0x240   : > { %p1191_p13 = pnand %p1196_p10, %p1846_p12 }
 0x242   : > { %p1192_p0 = pneg %p1191_p13 }
 0x244   : > { %1358 = dma.done.wait (%p1192_p0), %s968_s6, 512  }
 0x245   : > { %1360 = vsyncadd (%p1192_p0), %s968_s6, 4294966784  ;;  %s19_s25 = sadd.s32 1, %s1391_s25   ;;  %s1847_s18 = smov %s1367_s19 }
 0x246   : > { %p16_p1 = scmp.ge.s32.totalorder %s19_s25, 10   ;;  %s1848_s19 = smov %s1371_s20 }
 0x247   : > { %s1849_s20 = smov %s1512_s16  ;;  %s1850_s21 = smov %s1383_s23 }
 0x248   : > { %s1851_s22 = smov %s1387_s24  ;;  %s1852_s23 = smov %s1855_s28 }
 0x249   : > { %s1853_s24 = smov %s1859_s29  ;;  %18 = sbr.rel (!%p16_p1) target bundleno = 6 (0x6), region = 81 }
 0x24e   :  { %973 = vsyncpa [#allocation4], 1 }
 0x24f   :  { %975 = vsyncpa [#allocation4 + $0x1], 1 }
 0x250   :  { %976 = vsyncpa [#allocation5], 1 }
 0x251   :  { %978 = vsyncpa [#allocation5 + $0x1], 1 }

</bundles_post_ra>
